<compile_context>
chip_gen: v5e
topology: v5e:2x2
jax: 0.10.0
libtpu: 0.0.40
codegen_flags: <defaults>
</compile_context>

<pallas_src>
import math
from functools import partial

import jax
import jax.numpy as jnp
from jax.experimental import pallas as pl
from jax.experimental.pallas import tpu as pltpu


def _rup(x, m):
    return ((x + m - 1) // m) * m


def _apply_act(y, act):
    if act == 'lrelu':
        return jnp.where(y > 0, y, 0.2 * y)
    if act == 'relu':
        return jnp.maximum(y, 0.0)
    if act == 'sigmoid':
        return jax.nn.sigmoid(y)
    if act == 'tanh':
        return jnp.tanh(y)
    return y


# ----------------------------------------------------------------------------
# MXU matmul kernels: bf16 operands, f32 accumulate, fused bias + activation
# ----------------------------------------------------------------------------
def _mm_bias_act_kernel(a_ref, b_ref, bias_ref, o_ref, *, act):
    # nk == 1 fast path: full-K block, no accumulator scratch, no pl.when.
    y = jnp.dot(a_ref[...], b_ref[...],
                preferred_element_type=jnp.float32) + bias_ref[...]
    o_ref[...] = _apply_act(y, act)


def _mm_bias_act_split_kernel(a_ref, b_ref, bias_ref, o_ref, acc_ref, *, act):
    k = pl.program_id(2)

    @pl.when(k == 0)
    def _():
        acc_ref[...] = jnp.zeros_like(acc_ref)

    acc_ref[...] += jnp.dot(a_ref[...], b_ref[...],
                            preferred_element_type=jnp.float32)

    @pl.when(k == pl.num_programs(2) - 1)
    def _():
        o_ref[...] = _apply_act(acc_ref[...] + bias_ref[...], act)


_K_SPLIT = 2048
_VMEM_LIMIT = 32 * 1024 * 1024


def pallas_matmul_bias(a, wm, bias, n_out, act=None):
    """a: (M, Kp) bf16 (already K-padded), wm: (Kp, Np) bf16, bias: (1, Np) f32."""
    M, Kp = a.shape
    Np = wm.shape[1]

    mp8 = _rup(max(M, 8), 8)
    tm = mp8 if mp8 <= 256 else 256            # 256-wide M tiles for large convs
    Mp = _rup(M, tm)
    tn = 256 if Np % 256 == 0 else 128          # fill the 256-wide MXU (v6e/v7x)
    if Mp > M:
        a = jnp.pad(a, ((0, Mp - M), (0, 0)))

    # TODO(synk): on v7x, mark the M axis CORE_PARALLEL to shard across the two
    # TensorCores; kept generic ("parallel") here for portability.
    if Kp <= _K_SPLIT:
        out = pl.pallas_call(
            partial(_mm_bias_act_kernel, act=act),
            out_shape=jax.ShapeDtypeStruct((Mp, Np), jnp.float32),
            grid=(Mp // tm, Np // tn),
            in_specs=[pl.BlockSpec((tm, Kp), lambda i, j: (i, 0)),
                      pl.BlockSpec((Kp, tn), lambda i, j: (0, j)),
                      pl.BlockSpec((1, tn), lambda i, j: (0, j))],
            out_specs=pl.BlockSpec((tm, tn), lambda i, j: (i, j)),
            compiler_params=pltpu.CompilerParams(
                dimension_semantics=("parallel", "parallel"),
                vmem_limit_bytes=_VMEM_LIMIT),
        )(a, wm, bias)
    else:
        tk = next((c for c in (1024, 512, 256, 128) if Kp % c == 0), None)
        if tk is None:
            tk = 1024
            Kq = _rup(Kp, tk)
            a = jnp.pad(a, ((0, 0), (0, Kq - Kp)))
            wm = jnp.pad(wm, ((0, Kq - Kp), (0, 0)))
            Kp = Kq
        out = pl.pallas_call(
            partial(_mm_bias_act_split_kernel, act=act),
            out_shape=jax.ShapeDtypeStruct((Mp, Np), jnp.float32),
            grid=(Mp // tm, Np // tn, Kp // tk),
            in_specs=[pl.BlockSpec((tm, tk), lambda i, j, k: (i, k)),
                      pl.BlockSpec((tk, tn), lambda i, j, k: (k, j)),
                      pl.BlockSpec((1, tn), lambda i, j, k: (0, j))],
            out_specs=pl.BlockSpec((tm, tn), lambda i, j, k: (i, j)),
            scratch_shapes=[pltpu.VMEM((tm, tn), jnp.float32)],
            compiler_params=pltpu.CompilerParams(
                dimension_semantics=("parallel", "parallel", "arbitrary"),
                vmem_limit_bytes=_VMEM_LIMIT),
        )(a, wm, bias)
    return out[:M, :n_out]


# ----------------------------------------------------------------------------
# InstanceNorm kernels (NHWC), fused activation / residual add.
#   o = act_out( act_in(IN(x)) + r )      (r optional)
# Two paths: single-block (whole image in VMEM) and HW-tiled two-pass
# (stats kernel + apply kernel) for large images (v7x VMEM budget).
# ----------------------------------------------------------------------------
def _in_block_kernel(x_ref, o_ref, *, inv_hw, eps, act):
    x = x_ref[0]                                      # (HW, C)
    mean = jnp.sum(x, axis=0, keepdims=True) * inv_hw
    d = x - mean
    var = jnp.sum(d * d, axis=0, keepdims=True) * inv_hw
    o_ref[0] = _apply_act(d * jax.lax.rsqrt(var + eps), act)


def _in_block_add_kernel(x_ref, r_ref, o_ref, *, inv_hw, eps, act_in, act_out):
    x = x_ref[0]
    mean = jnp.sum(x, axis=0, keepdims=True) * inv_hw
    d = x - mean
    var = jnp.sum(d * d, axis=0, keepdims=True) * inv_hw
    y = _apply_act(d * jax.lax.rsqrt(var + eps), act_in) + r_ref[0]
    o_ref[0] = _apply_act(y, act_out)


def _in_stats_kernel(x_ref, s_ref, q_ref):
    t = pl.program_id(1)

    @pl.when(t == 0)
    def _():
        s_ref[...] = jnp.zeros_like(s_ref)
        q_ref[...] = jnp.zeros_like(q_ref)

    x = x_ref[0]                                      # (thw, C)
    s_ref[0] += jnp.sum(x, axis=0, keepdims=True)
    q_ref[0] += jnp.sum(x * x, axis=0, keepdims=True)


def _in_apply_kernel(x_ref, s_ref, q_ref, o_ref, *, inv_hw, eps, act):
    mean = s_ref[0] * inv_hw                          # (1, C)
    var = jnp.maximum(q_ref[0] * inv_hw - mean * mean, 0.0)
    scale = jax.lax.rsqrt(var + eps)
    o_ref[0] = _apply_act((x_ref[0] - mean) * scale, act)


def _in_apply_add_kernel(x_ref, r_ref, s_ref, q_ref, o_ref,
                         *, inv_hw, eps, act_in, act_out):
    mean = s_ref[0] * inv_hw
    var = jnp.maximum(q_ref[0] * inv_hw - mean * mean, 0.0)
    scale = jax.lax.rsqrt(var + eps)
    y = _apply_act((x_ref[0] - mean) * scale, act_in) + r_ref[0]
    o_ref[0] = _apply_act(y, act_out)


_IN_BLOCK_BYTES = 3 * 1024 * 1024   # above this per-image size, use HW tiling


def _in_tile(hw):
    for t in (2048, 1024, 512, 256, 128, 64, 32, 16, 8):
        if hw % t == 0:
            return t
    return None


def _in_run_block(x2, r2, act_in, act_out, eps):
    N, hw, C = x2.shape
    inv_hw = 1.0 / hw
    cp = pltpu.CompilerParams(dimension_semantics=("parallel",),
                              vmem_limit_bytes=_VMEM_LIMIT)
    if r2 is None:
        return pl.pallas_call(
            partial(_in_block_kernel, inv_hw=inv_hw, eps=eps, act=act_out),
            out_shape=jax.ShapeDtypeStruct((N, hw, C), jnp.float32),
            grid=(N,),
            in_specs=[pl.BlockSpec((1, hw, C), lambda n: (n, 0, 0))],
            out_specs=pl.BlockSpec((1, hw, C), lambda n: (n, 0, 0)),
            compiler_params=cp,
        )(x2)
    return pl.pallas_call(
        partial(_in_block_add_kernel, inv_hw=inv_hw, eps=eps,
                act_in=act_in, act_out=act_out),
        out_shape=jax.ShapeDtypeStruct((N, hw, C), jnp.float32),
        grid=(N,),
        in_specs=[pl.BlockSpec((1, hw, C), lambda n: (n, 0, 0)),
                  pl.BlockSpec((1, hw, C), lambda n: (n, 0, 0))],
        out_specs=pl.BlockSpec((1, hw, C), lambda n: (n, 0, 0)),
        compiler_params=cp,
    )(x2, r2)


def _in_run_tiled(x2, r2, act_in, act_out, eps, thw):
    N, hw, C = x2.shape
    inv_hw = 1.0 / hw
    nhw = hw // thw
    stats = jax.ShapeDtypeStruct((N, 1, C), jnp.float32)
    s, q = pl.pallas_call(
        _in_stats_kernel,
        out_shape=(stats, stats),
        grid=(N, nhw),
        in_specs=[pl.BlockSpec((1, thw, C), lambda n, t: (n, t, 0))],
        out_specs=(pl.BlockSpec((1, 1, C), lambda n, t: (n, 0, 0)),
                   pl.BlockSpec((1, 1, C), lambda n, t: (n, 0, 0))),
        compiler_params=pltpu.CompilerParams(
            dimension_semantics=("parallel", "arbitrary")),
    )(x2)
    if r2 is None:
        return pl.pallas_call(
            partial(_in_apply_kernel, inv_hw=inv_hw, eps=eps, act=act_out),
            out_shape=jax.ShapeDtypeStruct((N, hw, C), jnp.float32),
            grid=(N, nhw),
            in_specs=[pl.BlockSpec((1, thw, C), lambda n, t: (n, t, 0)),
                      pl.BlockSpec((1, 1, C), lambda n, t: (n, 0, 0)),
                      pl.BlockSpec((1, 1, C), lambda n, t: (n, 0, 0))],
            out_specs=pl.BlockSpec((1, thw, C), lambda n, t: (n, t, 0)),
            compiler_params=pltpu.CompilerParams(
                dimension_semantics=("parallel", "parallel")),
        )(x2, s, q)
    return pl.pallas_call(
        partial(_in_apply_add_kernel, inv_hw=inv_hw, eps=eps,
                act_in=act_in, act_out=act_out),
        out_shape=jax.ShapeDtypeStruct((N, hw, C), jnp.float32),
        grid=(N, nhw),
        in_specs=[pl.BlockSpec((1, thw, C), lambda n, t: (n, t, 0)),
                  pl.BlockSpec((1, thw, C), lambda n, t: (n, t, 0)),
                  pl.BlockSpec((1, 1, C), lambda n, t: (n, 0, 0)),
                  pl.BlockSpec((1, 1, C), lambda n, t: (n, 0, 0))],
        out_specs=pl.BlockSpec((1, thw, C), lambda n, t: (n, t, 0)),
        compiler_params=pltpu.CompilerParams(
            dimension_semantics=("parallel", "parallel")),
    )(x2, r2, s, q)


def _in_run(x, res, act_in, act_out, eps):
    N, H, W, C = x.shape
    hw = H * W
    x2 = x.reshape(N, hw, C).astype(jnp.float32)
    r2 = None if res is None else res.reshape(N, hw, C).astype(jnp.float32)
    thw = _in_tile(hw)
    if hw * C * 4 > _IN_BLOCK_BYTES and thw is not None:
        out = _in_run_tiled(x2, r2, act_in, act_out, eps, thw)
    else:
        out = _in_run_block(x2, r2, act_in, act_out, eps)
    return out.reshape(N, H, W, C)


def instance_norm(x, act=None, eps=1e-5):
    """act(InstanceNorm2d(affine=False)(x)); x: NHWC."""
    # TODO(synk): C<128 layers under-fill lanes; spatial->lane folding with a
    # strided XLU reduce would lift lane utilization on those kernels.
    return _in_run(x, None, None, act, eps)


def instance_norm_add(x, res, act_in=None, act_out='lrelu', eps=1e-5):
    """act_out(act_in(InstanceNorm(x)) + res); x, res: NHWC, same shape."""
    return _in_run(x, res, act_in, act_out, eps)


# ----------------------------------------------------------------------------
# PA gating kernel: o = x * sig(sh) * sig(sw) * sig(xc) with in-VMEM broadcasts
# (no full-size gate tensors in HBM).
# ----------------------------------------------------------------------------
def _pa_gate_kernel(x_ref, sh_ref, sw_ref, xc_ref, o_ref):
    x = x_ref[0]                               # (th, W, C)
    g = jax.nn.sigmoid(sh_ref[0]) * jax.nn.sigmoid(sw_ref[0])   # (th,1,C)*(W,C)
    o_ref[0] = x * g * jax.nn.sigmoid(xc_ref[0])                # * (th,W,1)


def _row_tile(H, W, C, budget=2 * 1024 * 1024):
    best = 1
    for t in range(1, H + 1):
        if H % t == 0 and t * W * C * 4 <= budget:
            best = t
    return best


def pa_gate(x, sh, sw, xc):
    """x:(N,H,W,C) f32, sh:(N,H,C), sw:(N,W,C), xc:(N,H,W,1)."""
    N, H, W, C = x.shape
    th = _row_tile(H, W, C)
    sh4 = sh.reshape(N, H, 1, C).astype(jnp.float32)
    return pl.pallas_call(
        _pa_gate_kernel,
        out_shape=jax.ShapeDtypeStruct((N, H, W, C), jnp.float32),
        grid=(N, H // th),
        in_specs=[pl.BlockSpec((1, th, W, C), lambda n, h: (n, h, 0, 0)),
                  pl.BlockSpec((1, th, 1, C), lambda n, h: (n, h, 0, 0)),
                  pl.BlockSpec((1, W, C), lambda n, h: (n, 0, 0)),
                  pl.BlockSpec((1, th, W, 1), lambda n, h: (n, h, 0, 0))],
        out_specs=pl.BlockSpec((1, th, W, C), lambda n, h: (n, h, 0, 0)),
        compiler_params=pltpu.CompilerParams(
            dimension_semantics=("parallel", "parallel")),
    )(x.astype(jnp.float32), sh4, sw.astype(jnp.float32),
      xc.astype(jnp.float32))


# ----------------------------------------------------------------------------
# Conv / ConvTranspose wrappers: im2col built once in bf16 with K-pad folded in
# ----------------------------------------------------------------------------
def conv2d(x, p, stride=1, padding=0, pad_mode='zero', act=None):
    """x: NHWC; p: prepped conv params (bf16 weight matrix, Kp = rup(K,16))."""
    N, H, W, Cin = x.shape
    kh, kw = p['kh'], p['kw']
    if padding > 0:
        mode = 'reflect' if pad_mode == 'reflect' else 'constant'
        x = jnp.pad(x, ((0, 0), (padding, padding),
                        (padding, padding), (0, 0)), mode=mode)
    x = x.astype(jnp.bfloat16)                        # cast once, before im2col
    Hp, Wp = x.shape[1], x.shape[2]
    Ho = (Hp - kh) // stride + 1
    Wo = (Wp - kw) // stride + 1
    K = kh * kw * Cin
    Kp = p['wm'].shape[0]
    if kh == 1 and kw == 1 and stride == 1:
        a = x.reshape(N * Ho * Wo, Cin)
        if Kp > Cin:
            a = jnp.pad(a, ((0, 0), (0, Kp - Cin)))
    else:
        parts = [x[:, ki::stride, kj::stride, :][:, :Ho, :Wo, :]
                 for ki in range(kh) for kj in range(kw)]
        if Kp > K:
            parts.append(jnp.zeros((N, Ho, Wo, Kp - K), jnp.bfloat16))
        a = jnp.concatenate(parts, axis=-1).reshape(N * Ho * Wo, Kp)
    # TODO(synk): fully fusing the kh*kw window walk into the matmul grid
    # (pl.Element-offset K steps) would remove the im2col HBM blow-up entirely.
    out = pallas_matmul_bias(a, p['wm'], p['b'], p['cout'], act=act)
    return out.reshape(N, Ho, Wo, p['cout'])


def conv_transpose2d(x, p, act=None):
    """ConvTranspose2d(k=3, stride=2, padding=1, output_padding=1) via the
    sub-pixel decomposition: one 2x2 im2col matmul on the undilated input
    produces all 4 output parities."""
    N, H, W, Cin = x.shape
    xp = jnp.pad(x.astype(jnp.bfloat16), ((0, 0), (0, 1), (0, 1), (0, 0)))
    parts = [xp[:, dy:dy + H, dx:dx + W, :] for dy in (0, 1) for dx in (0, 1)]
    K = 4 * Cin
    Kp = p['wm'].shape[0]
    if Kp > K:
        parts.append(jnp.zeros((N, H, W, Kp - K), jnp.bfloat16))
    a = jnp.concatenate(parts, axis=-1).reshape(N * H * W, Kp)
    cout = p['cout']
    out = pallas_matmul_bias(a, p['wm'], p['b'], 4 * cout, act=act)
    out = out.reshape(N, H, W, 2, 2, cout)
    # TODO(synk): the parity interleave below is a full HBM pass; folding it
    # into the next conv's im2col slicing would remove it.
    out = jnp.transpose(out, (0, 1, 3, 2, 4, 5)).reshape(N, 2 * H, 2 * W, cout)
    return out


def conv_in_act(x, p, act, padding=0, pad_mode='zero', stride=1):
    y = conv2d(x, p, stride=stride, padding=padding, pad_mode=pad_mode)
    return instance_norm(y, act=act)


# ----------------------------------------------------------------------------
# Parameter construction (deterministic synthetic weights; reshaped / padded /
# cast to bf16 ONCE, K padded only to the bf16 sublane tile of 16)
# ----------------------------------------------------------------------------
class ParamGen:
    def __init__(self, seed):
        self.key = jax.random.PRNGKey(seed)

    def take(self, shape, scale):
        self.key, sub = jax.random.split(self.key)
        return jax.random.normal(sub, shape, jnp.float32) * scale


def prep_conv(w, b):
    cout, cin, kh, kw = w.shape
    K = kh * kw * cin
    wm = jnp.transpose(w, (2, 3, 1, 0)).reshape(K, cout)
    Kp, Np = _rup(K, 16), _rup(cout, 128)
    wm = jnp.pad(wm, ((0, Kp - K), (0, Np - cout))).astype(jnp.bfloat16)
    bias = jnp.zeros((cout,), jnp.float32) if b is None else b.astype(jnp.float32)
    bias = jnp.pad(bias, (0, Np - cout)).reshape(1, Np)
    return {'wm': wm, 'b': bias, 'cout': cout, 'kh': kh, 'kw': kw}


def prep_convT(w, b):
    """w: (Cin, Cout, 3, 3) PyTorch ConvTranspose2d weight (s=2, p=1, op=1).
    Builds the (4*Cin, 4*Cout) sub-pixel weight matrix."""
    cin, cout, _, _ = w.shape
    wm = jnp.zeros((2, 2, cin, 4, cout), jnp.float32)   # (dy, dx, ci, parity, co)
    wm = wm.at[0, 0, :, 0, :].set(w[:, :, 1, 1])         # (even, even)
    wm = wm.at[0, 0, :, 1, :].set(w[:, :, 1, 2])         # (even, odd)
    wm = wm.at[0, 1, :, 1, :].set(w[:, :, 1, 0])
    wm = wm.at[0, 0, :, 2, :].set(w[:, :, 2, 1])         # (odd, even)
    wm = wm.at[1, 0, :, 2, :].set(w[:, :, 0, 1])
    wm = wm.at[0, 0, :, 3, :].set(w[:, :, 2, 2])         # (odd, odd)
    wm = wm.at[0, 1, :, 3, :].set(w[:, :, 2, 0])
    wm = wm.at[1, 0, :, 3, :].set(w[:, :, 0, 2])
    wm = wm.at[1, 1, :, 3, :].set(w[:, :, 0, 0])
    K, nout = 4 * cin, 4 * cout
    wm = wm.reshape(K, nout)
    Kp, Np = _rup(K, 16), _rup(nout, 128)
    wm = jnp.pad(wm, ((0, Kp - K), (0, Np - nout))).astype(jnp.bfloat16)
    bias = jnp.zeros((cout,), jnp.float32) if b is None else b.astype(jnp.float32)
    bias = jnp.pad(jnp.tile(bias, 4), (0, Np - nout)).reshape(1, Np)
    return {'wm': wm, 'b': bias, 'cout': cout}


def conv_p(pg, cin, cout, k, bias=True):
    fan = cin * k * k
    w = pg.take((cout, cin, k, k), 1.0 / math.sqrt(fan))
    b = pg.take((cout,), 0.02) if bias else None
    return prep_conv(w, b)


def convT_p(pg, cin, cout, bias=True):
    fan = cin * 9
    w = pg.take((cin, cout, 3, 3), 1.0 / math.sqrt(fan))
    b = pg.take((cout,), 0.02) if bias else None
    return prep_convT(w, b)


def layer_down_p(pg, cin, cout, n_extra):
    return {'first': {'down': conv_p(pg, cin, cout, 3, bias=False),
                      'c1': conv_p(pg, cin, cout, 3, bias=False),
                      'c2': conv_p(pg, cout, cout, 3, bias=False)},
            'rest': [{'c1': conv_p(pg, cout, cout, 3, bias=False),
                      'c2': conv_p(pg, cout, cout, 3, bias=False)}
                     for _ in range(n_extra)]}


def bblock_up_p(pg, cin, cout):
    return {'up': convT_p(pg, cin, cin),
            'down': convT_p(pg, cin, cout),
            'c1': conv_p(pg, cin, cout, 3, bias=False),
            'c2': conv_p(pg, cout, cout, 3, bias=False)}


def merge_p(pg, feat):
    red = 16
    cr = max(feat // red, 1)
    return {'gate': conv_p(pg, feat, feat, 1),
            'up': convT_p(pg, 2 * feat, feat),
            'pa': {'c1x1': conv_p(pg, feat, cr, 1, bias=False),
                   'Fh': conv_p(pg, cr, feat, 1, bias=False),
                   'Fw': conv_p(pg, cr, feat, 1, bias=False),
                   'conv1': conv_p(pg, 2, 1, 3, bias=False)}}


def build_params(input_nc=3, output_nc=3, seed=42):
    pg = ParamGen(seed)
    return {
        'inc': conv_p(pg, input_nc, 16, 7),
        'osc1': conv_p(pg, 128, 32, 3),
        'osc2': conv_p(pg, 32, 1, 3),
        'oseg': conv_p(pg, 1, 32, 3),
        'layer1': layer_down_p(pg, 16, 32, 0),
        'layer2': layer_down_p(pg, 32, 64, 0),
        'layer3': layer_down_p(pg, 64, 128, 0),
        'layer4': layer_down_p(pg, 128, 128, 1),
        'layer9': layer_down_p(pg, 32, 32, 1),
        'layer8': layer_down_p(pg, 160, 128, 3),
        'layer5': bblock_up_p(pg, 128, 64),
        'layer6': bblock_up_p(pg, 64, 32),
        'layer7': bblock_up_p(pg, 32, 16),
        'outc': conv_p(pg, 16, output_nc, 7),
        'merge1': merge_p(pg, 64),
        'merge2': merge_p(pg, 32),
        'merge3': merge_p(pg, 16),
        'conv1': conv_p(pg, 128, 64, 3),
        'conv2': conv_p(pg, 64, 32, 3),
        'conv3': conv_p(pg, 32, 16, 3),
    }


# ----------------------------------------------------------------------------
# Module forward pieces (all NHWC)
# ----------------------------------------------------------------------------
def basic_block_first(x, p, stride):
    idn = conv_in_act(x, p['down'], 'lrelu', padding=1, pad_mode='reflect',
                      stride=stride)
    y = conv_in_act(x, p['c1'], 'lrelu', padding=1, pad_mode='reflect',
                    stride=stride)
    y = conv2d(y, p['c2'], padding=1, pad_mode='reflect')
    return instance_norm_add(y, idn, act_in=None, act_out='lrelu')


def basic_block_plain(x, p):
    y = conv_in_act(x, p['c1'], 'lrelu', padding=1, pad_mode='reflect')
    y = conv2d(y, p['c2'], padding=1, pad_mode='reflect')
    return instance_norm_add(y, x, act_in=None, act_out='lrelu')


def basic_block_up(x, p):
    xu = instance_norm(conv_transpose2d(x, p['up']), act='lrelu')
    idn = instance_norm(conv_transpose2d(x, p['down']), act='lrelu')
    y = conv_in_act(xu, p['c1'], 'lrelu', padding=1, pad_mode='reflect')
    y = conv2d(y, p['c2'], padding=1, pad_mode='reflect')
    return instance_norm_add(y, idn, act_in=None, act_out='lrelu')


def run_down_layer(x, lp, stride):
    y = basic_block_first(x, lp['first'], stride)
    for bp in lp['rest']:
        y = basic_block_plain(y, bp)
    return y


def pa_block(x, p):
    N, H, W, C = x.shape
    x_h = jnp.mean(x, axis=2)                        # (N, H, C)
    x_w = jnp.mean(x, axis=1)                        # (N, W, C)
    x_c_mean = jnp.mean(x, axis=3, keepdims=True)    # (N, H, W, 1)
    x_c_max = jnp.max(x, axis=3, keepdims=True)
    xc = jnp.concatenate([x_c_mean, x_c_max], axis=-1)        # (N, H, W, 2)
    xc = conv2d(xc, p['conv1'], padding=1)                    # (N, H, W, 1)
    cat = jnp.concatenate([x_h, x_w], axis=1)[:, None, :, :]  # (N, 1, H+W, C)
    y = instance_norm(conv2d(cat, p['c1x1']), act='relu')     # (N, 1, H+W, Cr)
    sh = conv2d(y[:, :, :H, :], p['Fh']).reshape(N, H, C)
    sw = conv2d(y[:, :, H:, :], p['Fw']).reshape(N, W, C)
    return pa_gate(x, sh, sw, xc)


def merge_fwd(x1, x2, p):
    g = instance_norm(conv2d(x1, p['gate']), act='relu')
    u = conv_transpose2d(x2, p['up'])
    # fused: lrelu( relu(IN(u)) + g ) in one kernel
    z = instance_norm_add(u, g, act_in='relu', act_out='lrelu')
    return pa_block(z, p['pa'])


def resnet_pfa_forward(params, x_nchw):
    x = jnp.transpose(x_nchw, (0, 2, 3, 1)).astype(jnp.float32)   # NHWC

    x = conv_in_act(x, params['inc'], 'lrelu', padding=3, pad_mode='reflect')
    x1 = run_down_layer(x, params['layer1'], stride=2)    # 32 @ H/2
    x2 = run_down_layer(x1, params['layer2'], stride=2)   # 64 @ H/4
    x3 = run_down_layer(x2, params['layer3'], stride=2)   # 128 @ H/8

    t = conv_in_act(x3, params['osc1'], 'lrelu', padding=1, pad_mode='reflect')
    label_out = conv2d(t, params['osc2'], padding=1, pad_mode='reflect',
                       act='sigmoid')                      # sigmoid fused

    label_features = conv_in_act(label_out, params['oseg'], 'lrelu',
                                 padding=1, pad_mode='reflect')
    features = run_down_layer(x3, params['layer4'], stride=1)
    label_features = run_down_layer(label_features, params['layer9'], stride=1)
    features = jnp.concatenate([label_features, features], axis=-1)  # 160
    features = run_down_layer(features, params['layer8'], stride=1)  # 128
    # Dropout(0.2): identity at inference.
    # TODO(synk): training-mode dropout masking not implemented.

    x2m = merge_fwd(x2, features, params['merge1'])        # 64 @ H/4
    x4 = basic_block_up(features, params['layer5'])        # 64 @ H/4
    x2c = jnp.concatenate([x2m, x4], axis=-1)              # 128
    x2c = conv_in_act(x2c, params['conv1'], 'lrelu',
                      padding=1, pad_mode='reflect')       # 64

    x1m = merge_fwd(x1, x2c, params['merge2'])             # 32 @ H/2
    x4 = basic_block_up(x2c, params['layer6'])             # 32 @ H/2
    x1c = jnp.concatenate([x1m, x4], axis=-1)              # 64
    x1c = conv_in_act(x1c, params['conv2'], 'lrelu',
                      padding=1, pad_mode='reflect')       # 32

    xm = merge_fwd(x, x1c, params['merge3'])               # 16 @ H
    x4 = basic_block_up(x1c, params['layer7'])             # 16 @ H
    xc = jnp.concatenate([xm, x4], axis=-1)                # 32
    xc = conv_in_act(xc, params['conv3'], 'lrelu',
                     padding=1, pad_mode='reflect')        # 16

    out = conv2d(xc, params['outc'], padding=3, pad_mode='reflect',
                 act='tanh')                               # tanh fused

    to_nchw = lambda a: jnp.transpose(a, (0, 3, 1, 2))
    return to_nchw(out), to_nchw(features), to_nchw(label_out)


# ----------------------------------------------------------------------------
if __name__ == "__main__":
    # Self-check: the HW-tiled instance-norm path (used at large resolutions)
    # must match the single-block path.
    xt = jax.random.normal(jax.random.PRNGKey(1), (2, 64, 48), jnp.float32)
    rt = jax.random.normal(jax.random.PRNGKey(2), (2, 64, 48), jnp.float32)
    ref_a = _in_run_block(xt, None, None, 'lrelu', 1e-5)
    tst_a = _in_run_tiled(xt, None, None, 'lrelu', 1e-5, 16)
    ref_b = _in_run_block(xt, rt, 'relu', 'lrelu', 1e-5)
    tst_b = _in_run_tiled(xt, rt, 'relu', 'lrelu', 1e-5, 16)
    jax.block_until_ready((ref_a, tst_a, ref_b, tst_b))
    assert bool(jnp.max(jnp.abs(ref_a - tst_a)) < 5e-3)
    assert bool(jnp.max(jnp.abs(ref_b - tst_b)) < 5e-3)

    params = build_params(input_nc=3, output_nc=3, seed=42)
    x = jax.random.normal(jax.random.PRNGKey(0), (2, 3, 16, 16), jnp.float32)

    fwd = jax.jit(lambda inp: resnet_pfa_forward(params, inp))
    out, features, label_out = fwd(x)
    jax.block_until_ready((out, features, label_out))

    assert out.shape == (2, 3, 16, 16), out.shape
    assert features.shape == (2, 128, 2, 2), features.shape
    assert label_out.shape == (2, 1, 2, 2), label_out.shape
    assert bool(jnp.all(jnp.isfinite(out)))
    assert bool(jnp.all(jnp.isfinite(features)))
    assert bool(jnp.all(jnp.isfinite(label_out)))
    print("KERNEL_OK")
</pallas_src>

<mosaic_0001>
module attributes {stable_mosaic.version = 11 : i64} {
  func.func @_in_block_kernel(%arg0: i32, %arg1: memref<1x64x48xf32, #tpu.memory_space<vmem>>, %arg2: memref<1x64x48xf32, #tpu.memory_space<vmem>>) attributes {dimension_semantics = [#tpu.dimension_semantics<parallel>], iteration_bounds = array<i64: 2>, scalar_prefetch = 0 : i64, scratch_operands = 0 : i64, tpu.core_type = #tpu.core_type<tc>, window_params = [{transform_indices = @transform_0, window_bounds = array<i64: 1, 64, 48>}, {transform_indices = @transform_1, window_bounds = array<i64: 1, 64, 48>}]} {
    %c0 = arith.constant 0 : index
    %c0_0 = arith.constant 0 : index
    %c0_1 = arith.constant 0 : index
    %0 = vector.load %arg1[%c0, %c0_0, %c0_1] : memref<1x64x48xf32, #tpu.memory_space<vmem>>, vector<1x64x48xf32>
    %1 = vector.shape_cast %0 : vector<1x64x48xf32> to vector<64x48xf32>
    %cst = arith.constant dense<0.000000e+00> : vector<48xf32>
    %2 = vector.multi_reduction <add>, %1, %cst [0] : vector<64x48xf32> to vector<48xf32>
    %3 = vector.shape_cast %2 : vector<48xf32> to vector<1x48xf32>
    %cst_2 = arith.constant 1.562500e-02 : f32
    %4 = vector.broadcast %cst_2 : f32 to vector<1x48xf32>
    %5 = arith.mulf %3, %4 : vector<1x48xf32>
    %6 = vector.broadcast %5 : vector<1x48xf32> to vector<64x48xf32>
    %7 = arith.subf %1, %6 : vector<64x48xf32>
    %8 = arith.mulf %7, %7 : vector<64x48xf32>
    %cst_3 = arith.constant dense<0.000000e+00> : vector<48xf32>
    %9 = vector.multi_reduction <add>, %8, %cst_3 [0] : vector<64x48xf32> to vector<48xf32>
    %10 = vector.shape_cast %9 : vector<48xf32> to vector<1x48xf32>
    %cst_4 = arith.constant 1.562500e-02 : f32
    %11 = vector.broadcast %cst_4 : f32 to vector<1x48xf32>
    %12 = arith.mulf %10, %11 : vector<1x48xf32>
    %cst_5 = arith.constant 9.99999974E-6 : f32
    %13 = vector.broadcast %cst_5 : f32 to vector<1x48xf32>
    %14 = arith.addf %12, %13 : vector<1x48xf32>
    %15 = math.rsqrt %14 : vector<1x48xf32>
    %16 = vector.broadcast %15 : vector<1x48xf32> to vector<64x48xf32>
    %17 = arith.mulf %7, %16 : vector<64x48xf32>
    %cst_6 = arith.constant 0.000000e+00 : f32
    %18 = vector.broadcast %cst_6 : f32 to vector<64x48xf32>
    %19 = arith.cmpf ogt, %17, %18 : vector<64x48xf32>
    %cst_7 = arith.constant 2.000000e-01 : f32
    %20 = vector.broadcast %cst_7 : f32 to vector<64x48xf32>
    %21 = arith.mulf %20, %17 : vector<64x48xf32>
    %22 = arith.select %19, %17, %21 : vector<64x48xi1>, vector<64x48xf32>
    %c0_8 = arith.constant 0 : index
    %c0_9 = arith.constant 0 : index
    %c0_10 = arith.constant 0 : index
    %23 = vector.load %arg2[%c0_8, %c0_9, %c0_10] : memref<1x64x48xf32, #tpu.memory_space<vmem>>, vector<1x64x48xf32>
    %24 = vector.shape_cast %23 : vector<1x64x48xf32> to vector<64x48xf32>
    %25 = vector.shape_cast %22 : vector<64x48xf32> to vector<1x64x48xf32>
    tpu.vector_store %arg2[%c0_8, %c0_9, %c0_10], %25 {strides = array<i32>} : memref<1x64x48xf32, #tpu.memory_space<vmem>>, vector<1x64x48xf32>,
    return
  }
  func.func @transform_0(%arg0: i32) -> (i32, i32, i32) {
    %c0_i32 = arith.constant 0 : i32
    %c0_i32_0 = arith.constant 0 : i32
    %c0_i32_1 = arith.constant 0 : i32
    return %arg0, %c0_i32, %c0_i32_0 : i32, i32, i32
  }
  func.func @transform_1(%arg0: i32) -> (i32, i32, i32) {
    %c0_i32 = arith.constant 0 : i32
    %c0_i32_0 = arith.constant 0 : i32
    %c0_i32_1 = arith.constant 0 : i32
    return %arg0, %c0_i32, %c0_i32_0 : i32, i32, i32
  }
}

</mosaic_0001>

<bundles_post_ra>
// kernel: tpu_custom_call.1
= control target key start
LH: loop header
LB: loop body
LE: loop exit
PB: predicated region body
PF: predicated region fallthrough
CT: control target
= control target key end

     0   :  { %s333_s6 = smov 0   ;;  %s391_s0 = inlined_call_operand.vmem [shape: f32[2,64,48], index: 0, kind: input, shape index: {}]   ;;  %s392_s1 = inlined_call_operand.vmem [shape: f32[2,64,48], index: 1, kind: output, shape index: {}]  }
   0x1 LB: > { %s292_s7 = sadd.s32 4294967295, %s321_s6   ;;  %p296_p0 = scmp.ge.s32.totalorder %s321_s6, 1  ;;  %s321_s6 = sphi %s333_s6, %s11_s6  }
   0x2   : > { %p87_p1 = scmp.lt.s32.totalorder %s321_s6, 3 }
   0x4   : > { %p88_p2 = pnand %p296_p0, %p87_p1 }
   0x5   : > { %p107_p3 = scmp.lt.s32.totalorder (!%p88_p2), %s292_s7, 1 }
   0x6   : > { %91 = sbr.rel (%p88_p2) target bundleno = 110 (0x6e), region = 24 }
   0xb   : > { %s394_s7 = smov (!%p107_p3, %s292_s7), 1  ;;  %vm125_vm0 = vcmask 392192  }
   0xc   : > { %s303_s8 = sshll.u32 %s394_s7, 6 }
   0xd   : > { %s111_s11 = scalar_lea.vmem %s391_s0, %s303_s8  ;;  %s370_s14 = scalar_lea.vmem %s392_s1, %s303_s8 }
   0xe   : > { %v117_v0 = vld [vmem:[%s111_s11] sm:$0xff]  ;;  %v118_v1 = vld [vmem:[%s111_s11 + $0x8] sm:$0xff]  ;;  %v119_v2 = vld [vmem:[%s111_s11 + $0x10] sm:$0xff] }
   0xf   : > { %v120_v3 = vld [vmem:[%s111_s11 + $0x18] sm:$0xff]  ;;  %v126_v4 = vsel %vm125_vm0, %v117_v0, 0.0  ;;  %v127_v5 = vsel %vm125_vm0, %v118_v1, 0.0  ;;  %v129_v6 = vsel %vm125_vm0, %v119_v2, 0.0  ;;  %v121_v7 = vld [vmem:[%s111_s11 + $0x20] sm:$0xff]  ;;  %v122_v10 = vld [vmem:[%s111_s11 + $0x28] sm:$0xff] }
  0x10   : > { %v128_v8 = vadd.f32 %v127_v5, %v126_v4  ;;  %v131_v9 = vsel %vm125_vm0, %v120_v3, 0.0  ;;  %v133_v12 = vsel %vm125_vm0, %v121_v7, 0.0  ;;  %v123_v13 = vld [vmem:[%s111_s11 + $0x30] sm:$0xff]  ;;  %v135_v15 = vsel %vm125_vm0, %v122_v10, 0.0  ;;  %v124_v16 = vld [vmem:[%s111_s11 + $0x38] sm:$0xff] }
  0x11   : > { %v137_v18 = vsel %vm125_vm0, %v123_v13, 0.0  ;;  %v139_v20 = vsel %vm125_vm0, %v124_v16, 0.0 }
  0x12   : > { %v130_v11 = vadd.f32 %v129_v6, %v128_v8 }
  0x14   : > { %v132_v14 = vadd.f32 %v131_v9, %v130_v11 }
  0x16   : > { %v134_v17 = vadd.f32 %v133_v12, %v132_v14 }
  0x18   : > { %v136_v19 = vadd.f32 %v135_v15, %v134_v17 }
  0x1a   : > { %v138_v21 = vadd.f32 %v137_v18, %v136_v19 }
  0x1c   : > { %v140_v22 = vadd.f32 %v139_v20, %v138_v21 }
  0x1e   : > { %v141_v23 = vrot.slane %v140_v22, 4 }
  0x20   : > { %v142_v24 = vadd.f32 %v141_v23, %v140_v22 }
  0x22   : > { %v143_v25 = vrot.slane %v142_v24, 2 }
  0x24   : > { %v144_v26 = vadd.f32 %v143_v25, %v142_v24 }
  0x26   : > { %v145_v27 = vrot.slane %v144_v26, 1 }
  0x28   : > { %v146_v28 = vadd.f32 %v145_v27, %v144_v26 }
  0x2a   : > { %v147_v29 = vmul.f32 0.015625, %v146_v28 }
  0x2c   : > { %v148_v30 = vsub.f32 %v117_v0, %v147_v29  ;;  %v149_v31 = vsub.f32 %v118_v1, %v147_v29  ;;  %v150_v32 = vsub.f32 %v119_v2, %v147_v29  ;;  %v151_v33 = vsub.f32 %v120_v3, %v147_v29 }
  0x2d   : > { %v152_v34 = vsub.f32 %v121_v7, %v147_v29  ;;  %v153_v35 = vsub.f32 %v122_v10, %v147_v29  ;;  %v154_v40 = vsub.f32 %v123_v13, %v147_v29  ;;  %v155_v46 = vsub.f32 %v124_v16, %v147_v29 }
  0x2e   : > { %v156_v36 = vmul.f32 %v148_v30, %v148_v30  ;;  %v157_v37 = vmul.f32 %v149_v31, %v149_v31  ;;  %v158_v38 = vmul.f32 %v150_v32, %v150_v32  ;;  %v159_v39 = vmul.f32 %v151_v33, %v151_v33 }
  0x2f   : > { %v160_v41 = vmul.f32 %v152_v34, %v152_v34  ;;  %v161_v47 = vmul.f32 %v153_v35, %v153_v35  ;;  %v162_v50 = vmul.f32 %v154_v40, %v154_v40  ;;  %v163_v53 = vmul.f32 %v155_v46, %v155_v46 }
  0x30   : > { %v164_v42 = vsel %vm125_vm0, %v156_v36, 0.0  ;;  %v165_v43 = vsel %vm125_vm0, %v157_v37, 0.0  ;;  %v167_v44 = vsel %vm125_vm0, %v158_v38, 0.0  ;;  %v169_v48 = vsel %vm125_vm0, %v159_v39, 0.0 }
  0x31   : > { %v166_v45 = vadd.f32 %v165_v43, %v164_v42  ;;  %v171_v51 = vsel %vm125_vm0, %v160_v41, 0.0  ;;  %v173_v54 = vsel %vm125_vm0, %v161_v47, 0.0  ;;  %v175_v56 = vsel %vm125_vm0, %v162_v50, 0.0 }
  0x32   : > { %v177_v58 = vsel %vm125_vm0, %v163_v53, 0.0 }
  0x33   : > { %v168_v49 = vadd.f32 %v167_v44, %v166_v45 }
  0x35   : > { %v170_v52 = vadd.f32 %v169_v48, %v168_v49 }
  0x37   : > { %v172_v55 = vadd.f32 %v171_v51, %v170_v52 }
  0x39   : > { %v174_v57 = vadd.f32 %v173_v54, %v172_v55 }
  0x3b   : > { %v176_v59 = vadd.f32 %v175_v56, %v174_v57 }
  0x3d   : > { %v178_v60 = vadd.f32 %v177_v58, %v176_v59 }
  0x3f   : > { %v179_v61 = vrot.slane %v178_v60, 4 }
  0x41   : > { %v180_v62 = vadd.f32 %v179_v61, %v178_v60 }
  0x43   : > { %v181_v63 = vrot.slane %v180_v62, 2 }
  0x45   : > { %v182_v0 = vadd.f32 %v181_v63, %v180_v62 }
  0x47   : > { %v183_v1 = vrot.slane %v182_v0, 1 }
  0x49   : > { %v184_v2 = vadd.f32 %v183_v1, %v182_v0 }
  0x4b   : > { %v185_v3 = vmul.f32 0.015625, %v184_v2 }
  0x4d   : > { %v186_v4 = vadd.f32 1e-05, %v185_v3 }
  0x4f   : > { %313 = vrsqrt.f32 %v186_v4  ;;  %vm193_vm1 = vweird.f32 %v186_v4 }
  0x55   : > { %v314_v5 = vpop.eup %313 }
  0x56   : > { %v188_v6 = vmul.f32 %v314_v5, %v186_v4  ;;  %vm194_vm2 = vweird.f32 %v314_v5 }
  0x57   : > { %vm195_vm3 = vmor %vm193_vm1, %vm194_vm2 }
  0x58   : > { %v189_v7 = vmul.f32 %v314_v5, %v188_v6 }
  0x5a   : > { %v190_v8 = vmul.f32 0.5, %v189_v7 }
  0x5c   : > { %v191_v9 = vsub.f32 1.5, %v190_v8 }
  0x5e   : > { %v192_v10 = vmul.f32 %v314_v5, %v191_v9 }
  0x60   : > { %v196_v11 = vsel %vm195_vm3, %v314_v5, %v192_v10 }
  0x61   : > { %v197_v12 = vmul.f32 %v196_v11, %v148_v30  ;;  %v198_v13 = vmul.f32 %v196_v11, %v149_v31  ;;  %v199_v14 = vmul.f32 %v196_v11, %v150_v32  ;;  %v200_v15 = vmul.f32 %v196_v11, %v151_v33 }
  0x62   : > { %v201_v16 = vmul.f32 %v196_v11, %v152_v34  ;;  %v202_v17 = vmul.f32 %v196_v11, %v153_v35  ;;  %v203_v18 = vmul.f32 %v196_v11, %v154_v40  ;;  %v204_v19 = vmul.f32 %v196_v11, %v155_v46 }
  0x63   : > { %vm205_vm4 = vcmp.gt.f32.partialorder %v197_v12, 0.0  ;;  %v213_v20 = vmul.f32 0.2, %v197_v12  ;;  %vm206_vm5 = vcmp.gt.f32.partialorder %v198_v13, 0.0  ;;  %v214_v21 = vmul.f32 0.2, %v198_v13 }
  0x64   : > { %vm207_vm6 = vcmp.gt.f32.partialorder %v199_v14, 0.0  ;;  %v215_v22 = vmul.f32 0.2, %v199_v14  ;;  %vm208_vm7 = vcmp.gt.f32.partialorder %v200_v15, 0.0  ;;  %v216_v23 = vmul.f32 0.2, %v200_v15 }
  0x65   : > { %v221_v24 = vsel %vm205_vm4, %v197_v12, %v213_v20  ;;  %v222_v25 = vsel %vm206_vm5, %v198_v13, %v214_v21  ;;  %vm209_vm8 = vcmp.gt.f32.partialorder %v201_v16, 0.0  ;;  %v217_v26 = vmul.f32 0.2, %v201_v16 }
  0x66   : > { %229 = vst.msk [vmem:[%s370_s14] sm:$0xff] %vm125_vm0, %v221_v24  ;;  %v223_v27 = vsel %vm207_vm6, %v199_v14, %v215_v22  ;;  %v224_v28 = vsel %vm208_vm7, %v200_v15, %v216_v23  ;;  %vm210_vm9 = vcmp.gt.f32.partialorder %v202_v17, 0.0  ;;  %v218_v29 = vmul.f32 0.2, %v202_v17 }
  0x67   : > { %230 = vst.msk [vmem:[%s370_s14 + $0x8] sm:$0xff] %vm125_vm0, %v222_v25  ;;  %v225_v30 = vsel %vm209_vm8, %v201_v16, %v217_v26  ;;  %vm211_vm10 = vcmp.gt.f32.partialorder %v203_v18, 0.0  ;;  %v219_v31 = vmul.f32 0.2, %v203_v18  ;;  %vm212_vm11 = vcmp.gt.f32.partialorder %v204_v19, 0.0 }
  0x68   : > { %231 = vst.msk [vmem:[%s370_s14 + $0x10] sm:$0xff] %vm125_vm0, %v223_v27  ;;  %v226_v32 = vsel %vm210_vm9, %v202_v17, %v218_v29  ;;  %v220_v33 = vmul.f32 0.2, %v204_v19 }
  0x69   : > { %232 = vst.msk [vmem:[%s370_s14 + $0x18] sm:$0xff] %vm125_vm0, %v224_v28  ;;  %v227_v34 = vsel %vm211_vm10, %v203_v18, %v219_v31 }
  0x6a   : > { %233 = vst.msk [vmem:[%s370_s14 + $0x20] sm:$0xff] %vm125_vm0, %v225_v30  ;;  %v228_v35 = vsel %vm212_vm11, %v204_v19, %v220_v33 }
  0x6b   : > { %234 = vst.msk [vmem:[%s370_s14 + $0x28] sm:$0xff] %vm125_vm0, %v226_v32 }
  0x6c   : > { %235 = vst.msk [vmem:[%s370_s14 + $0x30] sm:$0xff] %vm125_vm0, %v227_v34 }
  0x6d   : > { %236 = vst.msk [vmem:[%s370_s14 + $0x38] sm:$0xff] %vm125_vm0, %v228_v35 }
  0x6e PF: > { %s11_s6 = sadd.s32 1, %s321_s6  }
  0x6f   : > { %p8_p4 = scmp.ge.s32.totalorder %s11_s6, 4  }
  0x71   :  { %10 = sbr.rel (!%p8_p4) target bundleno = 1 (0x1), region = 54 }

</bundles_post_ra>
